<compile_context>
chip_gen: v6e
topology: v6e:2x2x1
jax: 0.10.0
libtpu: 0.0.40
codegen_flags: <defaults>
</compile_context>

<pallas_src>
import math

import jax
import jax.numpy as jnp
from jax import lax
from jax.experimental import pallas as pl
from jax.experimental.pallas import tpu as pltpu
from jax.scipy.special import gammaln


def _student_t_fwd_kernel(params_ref, eps_ref, g_ref, z_ref, logp_ref):
    eps = eps_ref[...]                      # (TN, D) f32, standard normal
    g = g_ref[...]                          # (TN, D) f32, standard Gamma(df/2) draws

    sqrt_df = params_ref[0:1, :]            # (1, D)
    inv_df = params_ref[1:2, :]             # (1, D)
    coef = params_ref[2:3, :]               # (1, D)  = -0.5*(df+1)/D
    const = params_ref[3:4, 0:1]            # (1, 1)  = -mean_d(Z_d)

    # chi2(df) = 2 * Gamma(df/2);  z = eps * sqrt(df / chi2)   (rsqrt -> EUP slot)
    z = eps * sqrt_df * lax.rsqrt(2.0 * g)
    z_ref[...] = z.astype(z_ref.dtype)

    # log p(z) averaged over dims:  mean_d[ -0.5*(df+1)*log(1 + z^2/df) - Z_d ]
    t = coef * jnp.log(1.0 + (z * z) * inv_df)          # (TN, D)
    logp = jnp.sum(t, axis=1, keepdims=True) + const     # (TN, 1)
    logp_ref[...] = logp.astype(logp_ref.dtype)


def student_t_forward(df, num_samples, key, *, block_rows=1024):
    """Forward pass of the Student-T base distribution.

    df: (n_dim,) degrees of freedom (loc=0, scale=1 per dim).
    Returns (z, log_prob, eps, g); eps/g are the raw noise draws (returned so the
    caller / test can reproduce z with a pure-JAX reference).
    """
    df = jnp.asarray(df, jnp.float32)
    n_dim = df.shape[0]

    k_norm, k_gamma = jax.random.split(key)
    eps = jax.random.normal(k_norm, (num_samples, n_dim), dtype=jnp.float32)
    g = jax.random.gamma(k_gamma, 0.5 * df, (num_samples, n_dim), dtype=jnp.float32)

    # Hoisted, data-independent per-dim constants (tiny, computed once in plain JAX).
    log_norm = (0.5 * jnp.log(df) + 0.5 * math.log(math.pi)
                + gammaln(0.5 * df) - gammaln(0.5 * (df + 1.0)))     # Z_d
    const = -jnp.mean(log_norm)                                      # scalar: -mean_d(Z_d)
    params = jnp.stack([
        jnp.sqrt(df),                               # row 0: sqrt(df)
        1.0 / df,                                   # row 1: 1/df
        -0.5 * (df + 1.0) / n_dim,                  # row 2: coef (includes 1/D of the mean)
        jnp.full((n_dim,), const, jnp.float32),     # row 3: hoisted scalar constant
    ], axis=0).astype(jnp.float32)                  # (4, D)

    # Row-tile size: large (pipelining-friendly) but bounded so the double-buffered
    # working set (3 f32 (tn, D) blocks x 2 buffers) stays well under scoped VMEM.
    vmem_budget = 24 * 1024 * 1024
    rows_fit = vmem_budget // (2 * 3 * 4 * max(n_dim, 1))
    block_rows = int(max(8, min(block_rows, (rows_fit // 8) * 8)))
    tn = num_samples if num_samples <= block_rows else block_rows
    grid = (pl.cdiv(num_samples, tn),)

    z, logp = pl.pallas_call(
        _student_t_fwd_kernel,
        grid=grid,
        in_specs=[
            pl.BlockSpec((4, n_dim), lambda i: (0, 0)),      # params (tiny, re-used)
            pl.BlockSpec((tn, n_dim), lambda i: (i, 0)),     # eps
            pl.BlockSpec((tn, n_dim), lambda i: (i, 0)),     # gamma draws
        ],
        out_specs=(
            pl.BlockSpec((tn, n_dim), lambda i: (i, 0)),     # z
            pl.BlockSpec((tn, 1), lambda i: (i, 0)),         # log_prob (lane width 1; tiny)
        ),
        out_shape=(
            jax.ShapeDtypeStruct((num_samples, n_dim), jnp.float32),
            jax.ShapeDtypeStruct((num_samples, 1), jnp.float32),
        ),
        compiler_params=pltpu.CompilerParams(
            dimension_semantics=("parallel",)),
    )(params, eps, g)

    return z, logp[:, 0], eps, g


if __name__ == "__main__":
    key = jax.random.PRNGKey(0)

    def reference(df, eps, g):
        chi2 = 2.0 * g
        z = eps * jnp.sqrt(df / chi2)
        log_norm = (0.5 * jnp.log(df) + 0.5 * math.log(math.pi)
                    + gammaln(0.5 * df) - gammaln(0.5 * (df + 1.0)))
        logp = jnp.mean(-0.5 * (df + 1.0) * jnp.log1p(z ** 2 / df) - log_norm, axis=1)
        return z, logp

    # Module default: T(n_dim, df=2.0, trainable=False) -> df buffer = ones + 2.0 = 3.0.
    n_dim = 8
    df = jnp.ones((n_dim,), dtype=jnp.float32) + 2.0

    # (num_samples, block_rows): single-block case and a multi-block case with a
    # partial last tile to exercise the gridded/pipelined path.
    for case_id, (num_samples, block_rows) in enumerate([(32, 1024), (1000, 512)]):
        k = jax.random.fold_in(key, case_id)
        z, log_p, eps, g = student_t_forward(df, num_samples, k, block_rows=block_rows)
        z = jax.block_until_ready(z)
        log_p = jax.block_until_ready(log_p)

        z_ref, logp_ref = reference(df, eps, g)

        assert z.shape == (num_samples, n_dim)
        assert log_p.shape == (num_samples,)
        assert jnp.allclose(z, z_ref, atol=1e-4, rtol=1e-4), "z mismatch"
        assert jnp.allclose(log_p, logp_ref, atol=1e-4, rtol=1e-4), "log_prob mismatch"

    print("KERNEL_OK")
</pallas_src>

<mosaic_0001>
module attributes {stable_mosaic.version = 11 : i64} {
  func.func @_student_t_fwd_kernel(%arg0: i32, %arg1: memref<4x8xf32, #tpu.memory_space<vmem>>, %arg2: memref<32x8xf32, #tpu.memory_space<vmem>>, %arg3: memref<32x8xf32, #tpu.memory_space<vmem>>, %arg4: memref<32x8xf32, #tpu.memory_space<vmem>>, %arg5: memref<32x1xf32, #tpu.memory_space<vmem>>) attributes {dimension_semantics = [#tpu.dimension_semantics<parallel>], iteration_bounds = array<i64: 1>, scalar_prefetch = 0 : i64, scratch_operands = 0 : i64, tpu.core_type = #tpu.core_type<tc>, window_params = [{pipeline_mode = #tpu.pipeline_mode<synchronous>, transform_indices = @transform_0, window_bounds = array<i64: 4, 8>}, {transform_indices = @transform_1, window_bounds = array<i64: 32, 8>}, {transform_indices = @transform_2, window_bounds = array<i64: 32, 8>}, {transform_indices = @transform_3, window_bounds = array<i64: 32, 8>}, {transform_indices = @transform_4, window_bounds = array<i64: 32, 1>}]} {
    %c0 = arith.constant 0 : index
    %c0_0 = arith.constant 0 : index
    %0 = vector.load %arg2[%c0, %c0_0] : memref<32x8xf32, #tpu.memory_space<vmem>>, vector<32x8xf32>
    %c0_1 = arith.constant 0 : index
    %c0_2 = arith.constant 0 : index
    %1 = vector.load %arg3[%c0_1, %c0_2] : memref<32x8xf32, #tpu.memory_space<vmem>>, vector<32x8xf32>
    %c0_3 = arith.constant 0 : index
    %c0_4 = arith.constant 0 : index
    %2 = vector.load %arg1[%c0_3, %c0_4] : memref<4x8xf32, #tpu.memory_space<vmem>>, vector<1x8xf32>
    %c1 = arith.constant 1 : index
    %c0_5 = arith.constant 0 : index
    %3 = vector.load %arg1[%c1, %c0_5] : memref<4x8xf32, #tpu.memory_space<vmem>>, vector<1x8xf32>
    %c2 = arith.constant 2 : index
    %c0_6 = arith.constant 0 : index
    %4 = vector.load %arg1[%c2, %c0_6] : memref<4x8xf32, #tpu.memory_space<vmem>>, vector<1x8xf32>
    %c3 = arith.constant 3 : index
    %c0_7 = arith.constant 0 : index
    %5 = vector.load %arg1[%c3, %c0_7] : memref<4x8xf32, #tpu.memory_space<vmem>>, vector<1x1xf32>
    %6 = vector.broadcast %2 : vector<1x8xf32> to vector<32x8xf32>
    %7 = arith.mulf %0, %6 : vector<32x8xf32>
    %cst = arith.constant 2.000000e+00 : f32
    %8 = vector.broadcast %cst : f32 to vector<32x8xf32>
    %9 = arith.mulf %8, %1 : vector<32x8xf32>
    %10 = math.rsqrt %9 : vector<32x8xf32>
    %11 = arith.mulf %7, %10 : vector<32x8xf32>
    %c0_8 = arith.constant 0 : index
    %c0_9 = arith.constant 0 : index
    %12 = vector.load %arg4[%c0_8, %c0_9] : memref<32x8xf32, #tpu.memory_space<vmem>>, vector<32x8xf32>
    tpu.vector_store %arg4[%c0_8, %c0_9], %11 {strides = array<i32>} : memref<32x8xf32, #tpu.memory_space<vmem>>, vector<32x8xf32>,
    %13 = arith.mulf %11, %11 : vector<32x8xf32>
    %14 = vector.broadcast %3 : vector<1x8xf32> to vector<32x8xf32>
    %15 = arith.mulf %13, %14 : vector<32x8xf32>
    %cst_10 = arith.constant 1.000000e+00 : f32
    %16 = vector.broadcast %cst_10 : f32 to vector<32x8xf32>
    %17 = arith.addf %16, %15 : vector<32x8xf32>
    %18 = math.log %17 : vector<32x8xf32>
    %19 = vector.broadcast %4 : vector<1x8xf32> to vector<32x8xf32>
    %20 = arith.mulf %19, %18 : vector<32x8xf32>
    %cst_11 = arith.constant dense<0.000000e+00> : vector<32xf32>
    %21 = vector.multi_reduction <add>, %20, %cst_11 [1] : vector<32x8xf32> to vector<32xf32>
    %22 = vector.shape_cast %21 : vector<32xf32> to vector<32x1xf32>
    %23 = vector.broadcast %5 : vector<1x1xf32> to vector<32x1xf32>
    %24 = arith.addf %22, %23 : vector<32x1xf32>
    %c0_12 = arith.constant 0 : index
    %c0_13 = arith.constant 0 : index
    %25 = vector.load %arg5[%c0_12, %c0_13] : memref<32x1xf32, #tpu.memory_space<vmem>>, vector<32x1xf32>
    tpu.vector_store %arg5[%c0_12, %c0_13], %24 {strides = array<i32>} : memref<32x1xf32, #tpu.memory_space<vmem>>, vector<32x1xf32>,
    return
  }
  func.func @transform_0(%arg0: i32) -> (i32, i32) {
    %c0_i32 = arith.constant 0 : i32
    %c0_i32_0 = arith.constant 0 : i32
    %c0_i32_1 = arith.constant 0 : i32
    return %c0_i32, %c0_i32_0 : i32, i32
  }
  func.func @transform_1(%arg0: i32) -> (i32, i32) {
    %c0_i32 = arith.constant 0 : i32
    %c0_i32_0 = arith.constant 0 : i32
    return %arg0, %c0_i32 : i32, i32
  }
  func.func @transform_2(%arg0: i32) -> (i32, i32) {
    %c0_i32 = arith.constant 0 : i32
    %c0_i32_0 = arith.constant 0 : i32
    return %arg0, %c0_i32 : i32, i32
  }
  func.func @transform_3(%arg0: i32) -> (i32, i32) {
    %c0_i32 = arith.constant 0 : i32
    %c0_i32_0 = arith.constant 0 : i32
    return %arg0, %c0_i32 : i32, i32
  }
  func.func @transform_4(%arg0: i32) -> (i32, i32) {
    %c0_i32 = arith.constant 0 : i32
    %c0_i32_0 = arith.constant 0 : i32
    return %arg0, %c0_i32 : i32, i32
  }
}

</mosaic_0001>

<bundles_post_ra>
// kernel: tpu_custom_call.1
= control target key start
LH: loop header
LB: loop body
LE: loop exit
PB: predicated region body
PF: predicated region fallthrough
CT: control target
= control target key end

     0   :  { %vm48_vm0 = vcmask 64512   ;;  %vm105_vm1 = vcmask 7168   ;;  %s231_s2 = inlined_call_operand.vmem [shape: f32[32,8], index: 2, kind: input, shape index: {}]   ;;  %s232_s0 = inlined_call_operand.vmem [shape: f32[4,8], index: 0, kind: input, shape index: {}]   ;;  %s233_s1 = inlined_call_operand.vmem [shape: f32[32,8], index: 1, kind: input, shape index: {}]   ;;  %s234_s3 = inlined_call_operand.vmem [shape: f32[32,8], index: 3, kind: output, shape index: {0}]   ;;  %s235_s4 = inlined_call_operand.vmem [shape: f32[32,1], index: 4, kind: output, shape index: {1}]  }
   0x1   :  { %v22_v0 = vld [vmem:[%s231_s2 + $0x10] sm:$0xff]  ;;  %v20_v2 = vld [vmem:[%s231_s2] sm:$0xff]  ;;  %v23_v3 = vld [vmem:[%s231_s2 + $0x18] sm:$0xff] }
   0x2   :  { %v38_v1 = vmul.f32 2.0, %v22_v0  ;;  %v36_v4 = vmul.f32 2.0, %v20_v2  ;;  %v39_v5 = vmul.f32 2.0, %v23_v3  ;;  %v21_v6 = vld [vmem:[%s231_s2 + $0x8] sm:$0xff]  ;;  %v18_v8 = vld [vmem:[%s233_s1 + $0x10] sm:$0xff]  ;;  %v16_v10 = vld [vmem:[%s233_s1] sm:$0xff] }
   0x3   :  { %v37_v7 = vmul.f32 2.0, %v21_v6  ;;  %v118_v9 = vld [vmem:[%s232_s0] ss:$0 sm:$0xff]  ;;  %v19_v12 = vld [vmem:[%s233_s1 + $0x18] sm:$0xff]  ;;  %v17_v13 = vld [vmem:[%s233_s1 + $0x8] sm:$0xff] }
   0x4   :  { %122 = vrsqrt.f32 %v38_v1  ;;  %v34_v11 = vmul.f32 %v118_v9, %v18_v8  ;;  %v32_v14 = vmul.f32 %v118_v9, %v16_v10  ;;  %v35_v16 = vmul.f32 %v118_v9, %v19_v12  ;;  %v119_v20 = vld [vmem:[%s232_s0 + $0x1] ss:$0 sm:$0xff]  ;;  %v120_v39 = vld [vmem:[%s232_s0 + $0x2] ss:$0 sm:$0xff]  ;;  %v121_v55 = vld [vmem:[%s232_s0 + $0x3] ss:$0 sm:$0xff] }
   0x5   :  { %124 = vrsqrt.f32 %v36_v4  ;;  %v33_v18 = vmul.f32 %v118_v9, %v17_v13 }
   0x6   :  { %126 = vrsqrt.f32 %v39_v5 }
   0x7   :  { %128 = vrsqrt.f32 %v37_v7 }
  0x11   :  { %v123_v15 = vpop.eup %122 }
  0x12   :  { %v46_v17 = vmul.f32 %v123_v15, %v34_v11  ;;  %v125_v19 = vpop.eup %124 }
  0x13   :  { %v127_v21 = vpop.eup %126  ;;  %v44_v23 = vmul.f32 %v125_v19, %v32_v14 }
  0x14   :  { %v55_v22 = vmul.f32 %v46_v17, %v46_v17  ;;  %51 = vst.msk [vmem:[%s234_s3 + $0x10] sm:$0xff] %vm48_vm0, %v46_v17  ;;  %v129_v24 = vpop.eup %128  ;;  %v47_v25 = vmul.f32 %v127_v21, %v35_v16 }
  0x15   :  { %v53_v27 = vmul.f32 %v44_v23, %v44_v23  ;;  %49 = vst.msk [vmem:[%s234_s3] sm:$0xff] %vm48_vm0, %v44_v23  ;;  %v45_v28 = vmul.f32 %v129_v24, %v33_v18 }
  0x16   :  { %v63_v26 = vmul.f32 %v119_v20, %v55_v22  ;;  %52 = vst.msk [vmem:[%s234_s3 + $0x18] sm:$0xff] %vm48_vm0, %v47_v25  ;;  %v56_v29 = vmul.f32 %v47_v25, %v47_v25 }
  0x17   :  { %v61_v31 = vmul.f32 %v119_v20, %v53_v27  ;;  %50 = vst.msk [vmem:[%s234_s3 + $0x8] sm:$0xff] %vm48_vm0, %v45_v28  ;;  %v54_v32 = vmul.f32 %v45_v28, %v45_v28 }
  0x18   :  { %v67_v30 = vadd.f32 1.0, %v63_v26  ;;  %v64_v33 = vmul.f32 %v119_v20, %v56_v29 }
  0x19   :  { %v65_v34 = vadd.f32 1.0, %v61_v31  ;;  %v62_v35 = vmul.f32 %v119_v20, %v54_v32 }
  0x1a   :  { %130 = vlog2.f32 %v67_v30  ;;  %v68_v36 = vadd.f32 1.0, %v64_v33 }
  0x1b   :  { %132 = vlog2.f32 %v65_v34  ;;  %v66_v37 = vadd.f32 1.0, %v62_v35 }
  0x1c   :  { %134 = vlog2.f32 %v68_v36 }
  0x1d   :  { %136 = vlog2.f32 %v66_v37 }
  0x27   :  { %v131_v38 = vpop.eup %130 }
  0x28   :  { %v74_v40 = vmul.f32 0.6931472, %v131_v38  ;;  %v133_v41 = vpop.eup %132 }
  0x29   :  { %v135_v42 = vpop.eup %134  ;;  %v70_v44 = vmul.f32 0.6931472, %v133_v41 }
  0x2a   :  { %v83_v43 = vmul.f32 %v120_v39, %v74_v40  ;;  %v137_v45 = vpop.eup %136  ;;  %v76_v46 = vmul.f32 0.6931472, %v135_v42 }
  0x2b   :  { %v81_v48 = vmul.f32 %v120_v39, %v70_v44  ;;  %v72_v49 = vmul.f32 0.6931472, %v137_v45 }
  0x2c   :  { %v91_v47 = vsel %vm48_vm0, %v83_v43, 0.0  ;;  %v84_v50 = vmul.f32 %v120_v39, %v76_v46 }
  0x2d   :  { %92 = vadd.xlane.f32.xlu1 %v91_v47  ;;  %v85_v51 = vsel %vm48_vm0, %v81_v48, 0.0  ;;  %v82_v52 = vmul.f32 %v120_v39, %v72_v49 }
  0x2e   :  { %86 = vadd.xlane.f32.xlu0 %v85_v51  ;;  %v94_v53 = vsel %vm48_vm0, %v84_v50, 0.0 }
  0x2f   :  { %v88_v54 = vsel %vm48_vm0, %v82_v52, 0.0 }
  0x31   :  { %95 = vadd.xlane.f32.xlu1 %v94_v53 }
  0x32   :  { %89 = vadd.xlane.f32.xlu0 %v88_v54 }
  0xb6   :  { %v93_v56 = vpop.xlane.xlu1 %92 }
  0xb7   :  { %v103_v57 = vadd.f32 %v121_v55, %v93_v56  ;;  %v87_v58 = vpop.xlane.xlu0 %86 }
  0xb8   :  { %v101_v59 = vadd.f32 %v121_v55, %v87_v58 }
  0xb9   :  { %108 = vst.msk [vmem:[%s235_s4 + $0x10] sm:$0xff] %vm105_vm1, %v103_v57 }
  0xba   :  { %v96_v60 = vpop.xlane.xlu1 %95  ;;  %106 = vst.msk [vmem:[%s235_s4] sm:$0xff] %vm105_vm1, %v101_v59 }
  0xbb   :  { %v104_v61 = vadd.f32 %v121_v55, %v96_v60  ;;  %v90_v62 = vpop.xlane.xlu0 %89 }
  0xbc   :  { %v102_v63 = vadd.f32 %v121_v55, %v90_v62 }
  0xbd   :  { %109 = vst.msk [vmem:[%s235_s4 + $0x18] sm:$0xff] %vm105_vm1, %v104_v61 }
  0xbe   :  { %107 = vst.msk [vmem:[%s235_s4 + $0x8] sm:$0xff] %vm105_vm1, %v102_v63 }

</bundles_post_ra>
